<compile_context>
chip_gen: v6e
topology: v6e:2x2x1
jax: 0.10.0
libtpu: 0.0.40
codegen_flags: <defaults>
</compile_context>

<pallas_src>
import functools

import jax
import jax.numpy as jnp
from jax.experimental import pallas as pl
from jax.experimental.pallas import tpu as pltpu


def _round_up(x, m):
    return (x + m - 1) // m * m


def _ghmr_kernel(pred_ref, target_ref, lw_ref, out_ref, cnt_ref, sum_ref,
                 *, mu, bins, loss_weight):
    step = pl.program_id(0)

    @pl.when(step == 0)
    def _init():
        cnt_ref[...] = jnp.zeros_like(cnt_ref)
        sum_ref[...] = jnp.zeros_like(sum_ref)

    pred = pred_ref[...]
    target = target_ref[...]
    lw = lw_ref[...]

    # Authentic Smooth L1 loss and its gradient norm g in [0, 1).
    diff = pred - target
    sq = jnp.sqrt(diff * diff + mu * mu)
    loss = sq - mu
    g = jnp.abs(diff) / sq

    # Bin index = number of interior edges <= g (same float32 edges as the
    # reference: i/bins for i=1..bins-1; the top bin absorbs everything else).
    valid = lw > 0.0
    idx = jnp.zeros_like(g)
    for i in range(1, bins):
        idx = idx + (g >= (float(i) / float(bins))).astype(jnp.float32)
    bin_idx = jnp.where(valid, idx, -1.0)

    # Per-bin, per-lane partial histograms: counts and loss sums.  Only the
    # row (sublane) axis is reduced per tile; the cross-lane reduction is
    # deferred to the finalize step (once per call, not per bin per tile).
    zero = jnp.zeros_like(loss)
    cnt_rows = []
    sum_rows = []
    for i in range(bins):
        m = bin_idx == float(i)
        cnt_rows.append(jnp.sum(m.astype(jnp.float32), axis=0, keepdims=True))
        sum_rows.append(jnp.sum(jnp.where(m, loss, zero), axis=0, keepdims=True))
    cnt_ref[...] = cnt_ref[...] + jnp.concatenate(cnt_rows, axis=0)
    sum_ref[...] = sum_ref[...] + jnp.concatenate(sum_rows, axis=0)

    @pl.when(step == pl.num_programs(0) - 1)
    def _finalize():
        cnt = jnp.sum(cnt_ref[...], axis=1, keepdims=True)   # (bins, 1)
        s = jnp.sum(sum_ref[...], axis=1, keepdims=True)     # (bins, 1)
        has = cnt > 0.0
        n = jnp.sum(has.astype(jnp.float32), axis=0, keepdims=True)   # (1, 1)
        # tot = sum(label_weight) cancels:
        #   sum_i [(tot/num_i)/n * s_i] / tot == (1/n) * sum_i s_i/num_i
        terms = jnp.where(has, s / jnp.maximum(cnt, 1.0), jnp.zeros_like(s))
        total = jnp.sum(terms, axis=0, keepdims=True) / jnp.maximum(n, 1.0)
        out_ref[...] = total * loss_weight


def ghmr_loss(pred, target, label_weight, *, mu=0.02, bins=10, loss_weight=1.0,
              block_rows=1024):
    """GHM-R loss (momentum=0) via a lane-dense, row-tiled Pallas TPU kernel."""
    assert pred.shape == target.shape == label_weight.shape
    assert block_rows % 8 == 0

    lanes = 128
    total = int(pred.size)
    rows = max(_round_up(pl.cdiv(total, lanes), 8), 8)
    tm = block_rows if rows > block_rows else rows
    rows_padded = _round_up(rows, tm)
    padded_total = rows_padded * lanes
    grid = rows_padded // tm

    def pack(x):
        x = jnp.ravel(x).astype(jnp.float32)
        x = jnp.pad(x, (0, padded_total - total))   # pad: lw=0 -> ignored
        return x.reshape(rows_padded, lanes)

    pred2, target2, lw2 = pack(pred), pack(target), pack(label_weight)

    kernel = functools.partial(
        _ghmr_kernel, mu=float(mu), bins=int(bins), loss_weight=float(loss_weight))
    tile_spec = pl.BlockSpec((tm, lanes), lambda i: (i, 0))

    out = pl.pallas_call(
        kernel,
        out_shape=jax.ShapeDtypeStruct((1, 1), jnp.float32),
        grid_spec=pltpu.PrefetchScalarGridSpec(
            num_scalar_prefetch=0,
            grid=(grid,),
            in_specs=[tile_spec, tile_spec, tile_spec],
            out_specs=pl.BlockSpec((1, 1), lambda i: (0, 0)),
            scratch_shapes=[pltpu.VMEM((int(bins), lanes), jnp.float32),
                            pltpu.VMEM((int(bins), lanes), jnp.float32)],
        ),
        compiler_params=pltpu.CompilerParams(
            dimension_semantics=("arbitrary",)),   # reduction axis: serial
    )(pred2, target2, lw2)
    return out[0, 0]


def _ghmr_reference(pred, target, label_weight, *, mu=0.02, bins=10, loss_weight=1.0):
    """Pure-JAX reference mirroring the PyTorch forward (momentum=0)."""
    diff = pred - target
    sq = jnp.sqrt(diff * diff + mu * mu)
    loss = sq - mu
    g = jnp.abs(diff / sq)
    valid = label_weight > 0
    tot = jnp.maximum(jnp.sum(label_weight), 1.0)
    edges = [float(i) / bins for i in range(bins + 1)]
    edges[-1] = 1000.0
    weights = jnp.zeros_like(g)
    n = 0.0
    for i in range(bins):
        inds = (g >= edges[i]) & (g < edges[i + 1]) & valid
        num = jnp.sum(inds.astype(jnp.float32))
        has = num > 0
        weights = weights + jnp.where(
            inds, jnp.where(has, tot / jnp.maximum(num, 1.0), 0.0), 0.0)
        n = n + jnp.where(has, 1.0, 0.0)
    weights = weights / jnp.maximum(n, 1.0)
    return jnp.sum(loss * weights) / tot * loss_weight


if __name__ == "__main__":
    key = jax.random.PRNGKey(0)
    k1, k2, k3 = jax.random.split(key, 3)

    # [batch_num, 4] regression targets (class-agnostic box regression).
    batch_num, channels = 16, 4
    pred = jax.random.normal(k1, (batch_num, channels), dtype=jnp.float32)
    target = jax.random.normal(k2, (batch_num, channels), dtype=jnp.float32)
    label_weight = jax.random.bernoulli(
        k3, p=0.75, shape=(batch_num, channels)).astype(jnp.float32)

    out = jax.block_until_ready(ghmr_loss(pred, target, label_weight))
    ref = _ghmr_reference(pred, target, label_weight)
    assert jnp.allclose(out, ref, rtol=1e-4, atol=1e-5), (out, ref)

    # Exercise the multi-tile (grid > 1) accumulation path with a tiny tile.
    kb1, kb2, kb3 = jax.random.split(jax.random.PRNGKey(1), 3)
    big_n = 512
    pred_b = jax.random.normal(kb1, (big_n, channels), dtype=jnp.float32)
    target_b = jax.random.normal(kb2, (big_n, channels), dtype=jnp.float32)
    lw_b = jax.random.bernoulli(
        kb3, p=0.75, shape=(big_n, channels)).astype(jnp.float32)
    out_b = jax.block_until_ready(ghmr_loss(pred_b, target_b, lw_b, block_rows=8))
    ref_b = _ghmr_reference(pred_b, target_b, lw_b)
    assert jnp.allclose(out_b, ref_b, rtol=1e-4, atol=1e-5), (out_b, ref_b)

    print("KERNEL_OK")
</pallas_src>

<mosaic_0001>
module attributes {stable_mosaic.version = 11 : i64} {
  func.func @_ghmr_kernel(%arg0: i32, %arg1: memref<8x128xf32, #tpu.memory_space<vmem>>, %arg2: memref<8x128xf32, #tpu.memory_space<vmem>>, %arg3: memref<8x128xf32, #tpu.memory_space<vmem>>, %arg4: memref<1x1xf32, #tpu.memory_space<vmem>>, %arg5: memref<10x128xf32, #tpu.memory_space<vmem>>, %arg6: memref<10x128xf32, #tpu.memory_space<vmem>>) attributes {dimension_semantics = [#tpu.dimension_semantics<arbitrary>], iteration_bounds = array<i64: 1>, scalar_prefetch = 0 : i64, scratch_operands = 2 : i64, tpu.core_type = #tpu.core_type<tc>, window_params = [{transform_indices = @transform_0, window_bounds = array<i64: 8, 128>}, {transform_indices = @transform_1, window_bounds = array<i64: 8, 128>}, {transform_indices = @transform_2, window_bounds = array<i64: 8, 128>}, {pipeline_mode = #tpu.pipeline_mode<synchronous>, transform_indices = @transform_3, window_bounds = array<i64: 1, 1>}]} {
    %c0_i32 = arith.constant 0 : i32
    %0 = arith.cmpi eq, %arg0, %c0_i32 : i32
    %1 = arith.extui %0 : i1 to i32
    %c0_i32_0 = arith.constant 0 : i32
    %2 = arith.cmpi ne, %1, %c0_i32_0 : i32
    scf.if %2 {
      %cst_60 = arith.constant 0.000000e+00 : f32
      %167 = vector.broadcast %cst_60 : f32 to vector<10x128xf32>
      %c0_61 = arith.constant 0 : index
      %c0_62 = arith.constant 0 : index
      %168 = vector.load %arg5[%c0_61, %c0_62] : memref<10x128xf32, #tpu.memory_space<vmem>>, vector<10x128xf32>
      tpu.vector_store %arg5[%c0_61, %c0_62], %167 {strides = array<i32>} : memref<10x128xf32, #tpu.memory_space<vmem>>, vector<10x128xf32>,
      %cst_63 = arith.constant 0.000000e+00 : f32
      %169 = vector.broadcast %cst_63 : f32 to vector<10x128xf32>
      %c0_64 = arith.constant 0 : index
      %c0_65 = arith.constant 0 : index
      %170 = vector.load %arg6[%c0_64, %c0_65] : memref<10x128xf32, #tpu.memory_space<vmem>>, vector<10x128xf32>
      tpu.vector_store %arg6[%c0_64, %c0_65], %169 {strides = array<i32>} : memref<10x128xf32, #tpu.memory_space<vmem>>, vector<10x128xf32>,
    } else {
    }
    %c0 = arith.constant 0 : index
    %c0_1 = arith.constant 0 : index
    %3 = vector.load %arg1[%c0, %c0_1] : memref<8x128xf32, #tpu.memory_space<vmem>>, vector<8x128xf32>
    %c0_2 = arith.constant 0 : index
    %c0_3 = arith.constant 0 : index
    %4 = vector.load %arg2[%c0_2, %c0_3] : memref<8x128xf32, #tpu.memory_space<vmem>>, vector<8x128xf32>
    %c0_4 = arith.constant 0 : index
    %c0_5 = arith.constant 0 : index
    %5 = vector.load %arg3[%c0_4, %c0_5] : memref<8x128xf32, #tpu.memory_space<vmem>>, vector<8x128xf32>
    %6 = arith.subf %3, %4 : vector<8x128xf32>
    %7 = arith.mulf %6, %6 : vector<8x128xf32>
    %cst = arith.constant 4.000000e-04 : f32
    %8 = vector.broadcast %cst : f32 to vector<8x128xf32>
    %9 = arith.addf %7, %8 : vector<8x128xf32>
    %10 = math.sqrt %9 : vector<8x128xf32>
    %cst_6 = arith.constant 2.000000e-02 : f32
    %11 = vector.broadcast %cst_6 : f32 to vector<8x128xf32>
    %12 = arith.subf %10, %11 : vector<8x128xf32>
    %13 = math.absf %6 : vector<8x128xf32>
    %14 = arith.divf %13, %10 : vector<8x128xf32>
    %cst_7 = arith.constant 0.000000e+00 : f32
    %15 = vector.broadcast %cst_7 : f32 to vector<8x128xf32>
    %16 = arith.cmpf ogt, %5, %15 : vector<8x128xf32>
    %cst_8 = arith.constant 0.000000e+00 : f32
    %17 = vector.broadcast %cst_8 : f32 to vector<8x128xf32>
    %cst_9 = arith.constant 1.000000e-01 : f32
    %18 = vector.broadcast %cst_9 : f32 to vector<8x128xf32>
    %19 = arith.cmpf oge, %14, %18 : vector<8x128xf32>
    %20 = arith.extui %19 : vector<8x128xi1> to vector<8x128xi32>
    %21 = arith.sitofp %20 : vector<8x128xi32> to vector<8x128xf32>
    %22 = arith.addf %17, %21 : vector<8x128xf32>
    %cst_10 = arith.constant 2.000000e-01 : f32
    %23 = vector.broadcast %cst_10 : f32 to vector<8x128xf32>
    %24 = arith.cmpf oge, %14, %23 : vector<8x128xf32>
    %25 = arith.extui %24 : vector<8x128xi1> to vector<8x128xi32>
    %26 = arith.sitofp %25 : vector<8x128xi32> to vector<8x128xf32>
    %27 = arith.addf %22, %26 : vector<8x128xf32>
    %cst_11 = arith.constant 3.000000e-01 : f32
    %28 = vector.broadcast %cst_11 : f32 to vector<8x128xf32>
    %29 = arith.cmpf oge, %14, %28 : vector<8x128xf32>
    %30 = arith.extui %29 : vector<8x128xi1> to vector<8x128xi32>
    %31 = arith.sitofp %30 : vector<8x128xi32> to vector<8x128xf32>
    %32 = arith.addf %27, %31 : vector<8x128xf32>
    %cst_12 = arith.constant 4.000000e-01 : f32
    %33 = vector.broadcast %cst_12 : f32 to vector<8x128xf32>
    %34 = arith.cmpf oge, %14, %33 : vector<8x128xf32>
    %35 = arith.extui %34 : vector<8x128xi1> to vector<8x128xi32>
    %36 = arith.sitofp %35 : vector<8x128xi32> to vector<8x128xf32>
    %37 = arith.addf %32, %36 : vector<8x128xf32>
    %cst_13 = arith.constant 5.000000e-01 : f32
    %38 = vector.broadcast %cst_13 : f32 to vector<8x128xf32>
    %39 = arith.cmpf oge, %14, %38 : vector<8x128xf32>
    %40 = arith.extui %39 : vector<8x128xi1> to vector<8x128xi32>
    %41 = arith.sitofp %40 : vector<8x128xi32> to vector<8x128xf32>
    %42 = arith.addf %37, %41 : vector<8x128xf32>
    %cst_14 = arith.constant 6.000000e-01 : f32
    %43 = vector.broadcast %cst_14 : f32 to vector<8x128xf32>
    %44 = arith.cmpf oge, %14, %43 : vector<8x128xf32>
    %45 = arith.extui %44 : vector<8x128xi1> to vector<8x128xi32>
    %46 = arith.sitofp %45 : vector<8x128xi32> to vector<8x128xf32>
    %47 = arith.addf %42, %46 : vector<8x128xf32>
    %cst_15 = arith.constant 0.699999988 : f32
    %48 = vector.broadcast %cst_15 : f32 to vector<8x128xf32>
    %49 = arith.cmpf oge, %14, %48 : vector<8x128xf32>
    %50 = arith.extui %49 : vector<8x128xi1> to vector<8x128xi32>
    %51 = arith.sitofp %50 : vector<8x128xi32> to vector<8x128xf32>
    %52 = arith.addf %47, %51 : vector<8x128xf32>
    %cst_16 = arith.constant 8.000000e-01 : f32
    %53 = vector.broadcast %cst_16 : f32 to vector<8x128xf32>
    %54 = arith.cmpf oge, %14, %53 : vector<8x128xf32>
    %55 = arith.extui %54 : vector<8x128xi1> to vector<8x128xi32>
    %56 = arith.sitofp %55 : vector<8x128xi32> to vector<8x128xf32>
    %57 = arith.addf %52, %56 : vector<8x128xf32>
    %cst_17 = arith.constant 0.899999976 : f32
    %58 = vector.broadcast %cst_17 : f32 to vector<8x128xf32>
    %59 = arith.cmpf oge, %14, %58 : vector<8x128xf32>
    %60 = arith.extui %59 : vector<8x128xi1> to vector<8x128xi32>
    %61 = arith.sitofp %60 : vector<8x128xi32> to vector<8x128xf32>
    %62 = arith.addf %57, %61 : vector<8x128xf32>
    %cst_18 = arith.constant -1.000000e+00 : f32
    %63 = vector.broadcast %cst_18 : f32 to vector<8x128xf32>
    %64 = arith.select %16, %62, %63 : vector<8x128xi1>, vector<8x128xf32>
    %cst_19 = arith.constant 0.000000e+00 : f32
    %65 = vector.broadcast %cst_19 : f32 to vector<8x128xf32>
    %cst_20 = arith.constant 0.000000e+00 : f32
    %66 = vector.broadcast %cst_20 : f32 to vector<8x128xf32>
    %67 = arith.cmpf oeq, %64, %66 : vector<8x128xf32>
    %68 = arith.extui %67 : vector<8x128xi1> to vector<8x128xi32>
    %69 = arith.sitofp %68 : vector<8x128xi32> to vector<8x128xf32>
    %cst_21 = arith.constant dense<0.000000e+00> : vector<128xf32>
    %70 = vector.multi_reduction <add>, %69, %cst_21 [0] : vector<8x128xf32> to vector<128xf32>
    %71 = vector.shape_cast %70 : vector<128xf32> to vector<1x128xf32>
    %72 = arith.select %67, %12, %65 : vector<8x128xi1>, vector<8x128xf32>
    %cst_22 = arith.constant dense<0.000000e+00> : vector<128xf32>
    %73 = vector.multi_reduction <add>, %72, %cst_22 [0] : vector<8x128xf32> to vector<128xf32>
    %74 = vector.shape_cast %73 : vector<128xf32> to vector<1x128xf32>
    %cst_23 = arith.constant 1.000000e+00 : f32
    %75 = vector.broadcast %cst_23 : f32 to vector<8x128xf32>
    %76 = arith.cmpf oeq, %64, %75 : vector<8x128xf32>
    %77 = arith.extui %76 : vector<8x128xi1> to vector<8x128xi32>
    %78 = arith.sitofp %77 : vector<8x128xi32> to vector<8x128xf32>
    %cst_24 = arith.constant dense<0.000000e+00> : vector<128xf32>
    %79 = vector.multi_reduction <add>, %78, %cst_24 [0] : vector<8x128xf32> to vector<128xf32>
    %80 = vector.shape_cast %79 : vector<128xf32> to vector<1x128xf32>
    %81 = arith.select %76, %12, %65 : vector<8x128xi1>, vector<8x128xf32>
    %cst_25 = arith.constant dense<0.000000e+00> : vector<128xf32>
    %82 = vector.multi_reduction <add>, %81, %cst_25 [0] : vector<8x128xf32> to vector<128xf32>
    %83 = vector.shape_cast %82 : vector<128xf32> to vector<1x128xf32>
    %cst_26 = arith.constant 2.000000e+00 : f32
    %84 = vector.broadcast %cst_26 : f32 to vector<8x128xf32>
    %85 = arith.cmpf oeq, %64, %84 : vector<8x128xf32>
    %86 = arith.extui %85 : vector<8x128xi1> to vector<8x128xi32>
    %87 = arith.sitofp %86 : vector<8x128xi32> to vector<8x128xf32>
    %cst_27 = arith.constant dense<0.000000e+00> : vector<128xf32>
    %88 = vector.multi_reduction <add>, %87, %cst_27 [0] : vector<8x128xf32> to vector<128xf32>
    %89 = vector.shape_cast %88 : vector<128xf32> to vector<1x128xf32>
    %90 = arith.select %85, %12, %65 : vector<8x128xi1>, vector<8x128xf32>
    %cst_28 = arith.constant dense<0.000000e+00> : vector<128xf32>
    %91 = vector.multi_reduction <add>, %90, %cst_28 [0] : vector<8x128xf32> to vector<128xf32>
    %92 = vector.shape_cast %91 : vector<128xf32> to vector<1x128xf32>
    %cst_29 = arith.constant 3.000000e+00 : f32
    %93 = vector.broadcast %cst_29 : f32 to vector<8x128xf32>
    %94 = arith.cmpf oeq, %64, %93 : vector<8x128xf32>
    %95 = arith.extui %94 : vector<8x128xi1> to vector<8x128xi32>
    %96 = arith.sitofp %95 : vector<8x128xi32> to vector<8x128xf32>
    %cst_30 = arith.constant dense<0.000000e+00> : vector<128xf32>
    %97 = vector.multi_reduction <add>, %96, %cst_30 [0] : vector<8x128xf32> to vector<128xf32>
    %98 = vector.shape_cast %97 : vector<128xf32> to vector<1x128xf32>
    %99 = arith.select %94, %12, %65 : vector<8x128xi1>, vector<8x128xf32>
    %cst_31 = arith.constant dense<0.000000e+00> : vector<128xf32>
    %100 = vector.multi_reduction <add>, %99, %cst_31 [0] : vector<8x128xf32> to vector<128xf32>
    %101 = vector.shape_cast %100 : vector<128xf32> to vector<1x128xf32>
    %cst_32 = arith.constant 4.000000e+00 : f32
    %102 = vector.broadcast %cst_32 : f32 to vector<8x128xf32>
    %103 = arith.cmpf oeq, %64, %102 : vector<8x128xf32>
    %104 = arith.extui %103 : vector<8x128xi1> to vector<8x128xi32>
    %105 = arith.sitofp %104 : vector<8x128xi32> to vector<8x128xf32>
    %cst_33 = arith.constant dense<0.000000e+00> : vector<128xf32>
    %106 = vector.multi_reduction <add>, %105, %cst_33 [0] : vector<8x128xf32> to vector<128xf32>
    %107 = vector.shape_cast %106 : vector<128xf32> to vector<1x128xf32>
    %108 = arith.select %103, %12, %65 : vector<8x128xi1>, vector<8x128xf32>
    %cst_34 = arith.constant dense<0.000000e+00> : vector<128xf32>
    %109 = vector.multi_reduction <add>, %108, %cst_34 [0] : vector<8x128xf32> to vector<128xf32>
    %110 = vector.shape_cast %109 : vector<128xf32> to vector<1x128xf32>
    %cst_35 = arith.constant 5.000000e+00 : f32
    %111 = vector.broadcast %cst_35 : f32 to vector<8x128xf32>
    %112 = arith.cmpf oeq, %64, %111 : vector<8x128xf32>
    %113 = arith.extui %112 : vector<8x128xi1> to vector<8x128xi32>
    %114 = arith.sitofp %113 : vector<8x128xi32> to vector<8x128xf32>
    %cst_36 = arith.constant dense<0.000000e+00> : vector<128xf32>
    %115 = vector.multi_reduction <add>, %114, %cst_36 [0] : vector<8x128xf32> to vector<128xf32>
    %116 = vector.shape_cast %115 : vector<128xf32> to vector<1x128xf32>
    %117 = arith.select %112, %12, %65 : vector<8x128xi1>, vector<8x128xf32>
    %cst_37 = arith.constant dense<0.000000e+00> : vector<128xf32>
    %118 = vector.multi_reduction <add>, %117, %cst_37 [0] : vector<8x128xf32> to vector<128xf32>
    %119 = vector.shape_cast %118 : vector<128xf32> to vector<1x128xf32>
    %cst_38 = arith.constant 6.000000e+00 : f32
    %120 = vector.broadcast %cst_38 : f32 to vector<8x128xf32>
    %121 = arith.cmpf oeq, %64, %120 : vector<8x128xf32>
    %122 = arith.extui %121 : vector<8x128xi1> to vector<8x128xi32>
    %123 = arith.sitofp %122 : vector<8x128xi32> to vector<8x128xf32>
    %cst_39 = arith.constant dense<0.000000e+00> : vector<128xf32>
    %124 = vector.multi_reduction <add>, %123, %cst_39 [0] : vector<8x128xf32> to vector<128xf32>
    %125 = vector.shape_cast %124 : vector<128xf32> to vector<1x128xf32>
    %126 = arith.select %121, %12, %65 : vector<8x128xi1>, vector<8x128xf32>
    %cst_40 = arith.constant dense<0.000000e+00> : vector<128xf32>
    %127 = vector.multi_reduction <add>, %126, %cst_40 [0] : vector<8x128xf32> to vector<128xf32>
    %128 = vector.shape_cast %127 : vector<128xf32> to vector<1x128xf32>
    %cst_41 = arith.constant 7.000000e+00 : f32
    %129 = vector.broadcast %cst_41 : f32 to vector<8x128xf32>
    %130 = arith.cmpf oeq, %64, %129 : vector<8x128xf32>
    %131 = arith.extui %130 : vector<8x128xi1> to vector<8x128xi32>
    %132 = arith.sitofp %131 : vector<8x128xi32> to vector<8x128xf32>
    %cst_42 = arith.constant dense<0.000000e+00> : vector<128xf32>
    %133 = vector.multi_reduction <add>, %132, %cst_42 [0] : vector<8x128xf32> to vector<128xf32>
    %134 = vector.shape_cast %133 : vector<128xf32> to vector<1x128xf32>
    %135 = arith.select %130, %12, %65 : vector<8x128xi1>, vector<8x128xf32>
    %cst_43 = arith.constant dense<0.000000e+00> : vector<128xf32>
    %136 = vector.multi_reduction <add>, %135, %cst_43 [0] : vector<8x128xf32> to vector<128xf32>
    %137 = vector.shape_cast %136 : vector<128xf32> to vector<1x128xf32>
    %cst_44 = arith.constant 8.000000e+00 : f32
    %138 = vector.broadcast %cst_44 : f32 to vector<8x128xf32>
    %139 = arith.cmpf oeq, %64, %138 : vector<8x128xf32>
    %140 = arith.extui %139 : vector<8x128xi1> to vector<8x128xi32>
    %141 = arith.sitofp %140 : vector<8x128xi32> to vector<8x128xf32>
    %cst_45 = arith.constant dense<0.000000e+00> : vector<128xf32>
    %142 = vector.multi_reduction <add>, %141, %cst_45 [0] : vector<8x128xf32> to vector<128xf32>
    %143 = vector.shape_cast %142 : vector<128xf32> to vector<1x128xf32>
    %144 = arith.select %139, %12, %65 : vector<8x128xi1>, vector<8x128xf32>
    %cst_46 = arith.constant dense<0.000000e+00> : vector<128xf32>
    %145 = vector.multi_reduction <add>, %144, %cst_46 [0] : vector<8x128xf32> to vector<128xf32>
    %146 = vector.shape_cast %145 : vector<128xf32> to vector<1x128xf32>
    %cst_47 = arith.constant 9.000000e+00 : f32
    %147 = vector.broadcast %cst_47 : f32 to vector<8x128xf32>
    %148 = arith.cmpf oeq, %64, %147 : vector<8x128xf32>
    %149 = arith.extui %148 : vector<8x128xi1> to vector<8x128xi32>
    %150 = arith.sitofp %149 : vector<8x128xi32> to vector<8x128xf32>
    %cst_48 = arith.constant dense<0.000000e+00> : vector<128xf32>
    %151 = vector.multi_reduction <add>, %150, %cst_48 [0] : vector<8x128xf32> to vector<128xf32>
    %152 = vector.shape_cast %151 : vector<128xf32> to vector<1x128xf32>
    %153 = arith.select %148, %12, %65 : vector<8x128xi1>, vector<8x128xf32>
    %cst_49 = arith.constant dense<0.000000e+00> : vector<128xf32>
    %154 = vector.multi_reduction <add>, %153, %cst_49 [0] : vector<8x128xf32> to vector<128xf32>
    %155 = vector.shape_cast %154 : vector<128xf32> to vector<1x128xf32>
    %c0_50 = arith.constant 0 : index
    %c0_51 = arith.constant 0 : index
    %156 = vector.load %arg5[%c0_50, %c0_51] : memref<10x128xf32, #tpu.memory_space<vmem>>, vector<10x128xf32>
    %157 = tpu.concatenate %71, %80, %89, %98, %107, %116, %125, %134, %143, %152 in 0 : vector<1x128xf32>, vector<1x128xf32>, vector<1x128xf32>, vector<1x128xf32>, vector<1x128xf32>, vector<1x128xf32>, vector<1x128xf32>, vector<1x128xf32>, vector<1x128xf32>, vector<1x128xf32> -> vector<10x128xf32>
    %158 = arith.addf %156, %157 : vector<10x128xf32>
    %c0_52 = arith.constant 0 : index
    %c0_53 = arith.constant 0 : index
    %159 = vector.load %arg5[%c0_52, %c0_53] : memref<10x128xf32, #tpu.memory_space<vmem>>, vector<10x128xf32>
    tpu.vector_store %arg5[%c0_52, %c0_53], %158 {strides = array<i32>} : memref<10x128xf32, #tpu.memory_space<vmem>>, vector<10x128xf32>,
    %c0_54 = arith.constant 0 : index
    %c0_55 = arith.constant 0 : index
    %160 = vector.load %arg6[%c0_54, %c0_55] : memref<10x128xf32, #tpu.memory_space<vmem>>, vector<10x128xf32>
    %161 = tpu.concatenate %74, %83, %92, %101, %110, %119, %128, %137, %146, %155 in 0 : vector<1x128xf32>, vector<1x128xf32>, vector<1x128xf32>, vector<1x128xf32>, vector<1x128xf32>, vector<1x128xf32>, vector<1x128xf32>, vector<1x128xf32>, vector<1x128xf32>, vector<1x128xf32> -> vector<10x128xf32>
    %162 = arith.addf %160, %161 : vector<10x128xf32>
    %c0_56 = arith.constant 0 : index
    %c0_57 = arith.constant 0 : index
    %163 = vector.load %arg6[%c0_56, %c0_57] : memref<10x128xf32, #tpu.memory_space<vmem>>, vector<10x128xf32>
    tpu.vector_store %arg6[%c0_56, %c0_57], %162 {strides = array<i32>} : memref<10x128xf32, #tpu.memory_space<vmem>>, vector<10x128xf32>,
    %c0_i32_58 = arith.constant 0 : i32
    %164 = arith.cmpi eq, %arg0, %c0_i32_58 : i32
    %165 = arith.extui %164 : i1 to i32
    %c0_i32_59 = arith.constant 0 : i32
    %166 = arith.cmpi ne, %165, %c0_i32_59 : i32
    scf.if %166 {
      %c0_60 = arith.constant 0 : index
      %c0_61 = arith.constant 0 : index
      %167 = vector.load %arg5[%c0_60, %c0_61] : memref<10x128xf32, #tpu.memory_space<vmem>>, vector<10x128xf32>
      %cst_62 = arith.constant dense<0.000000e+00> : vector<10xf32>
      %168 = vector.multi_reduction <add>, %167, %cst_62 [1] : vector<10x128xf32> to vector<10xf32>
      %169 = vector.shape_cast %168 : vector<10xf32> to vector<10x1xf32>
      %c0_63 = arith.constant 0 : index
      %c0_64 = arith.constant 0 : index
      %170 = vector.load %arg6[%c0_63, %c0_64] : memref<10x128xf32, #tpu.memory_space<vmem>>, vector<10x128xf32>
      %cst_65 = arith.constant dense<0.000000e+00> : vector<10xf32>
      %171 = vector.multi_reduction <add>, %170, %cst_65 [1] : vector<10x128xf32> to vector<10xf32>
      %172 = vector.shape_cast %171 : vector<10xf32> to vector<10x1xf32>
      %cst_66 = arith.constant 0.000000e+00 : f32
      %173 = vector.broadcast %cst_66 : f32 to vector<10x1xf32>
      %174 = arith.cmpf ogt, %169, %173 : vector<10x1xf32>
      %175 = arith.extui %174 : vector<10x1xi1> to vector<10x1xi32>
      %176 = arith.sitofp %175 : vector<10x1xi32> to vector<10x1xf32>
      %cst_67 = arith.constant dense<0.000000e+00> : vector<1xf32>
      %177 = vector.multi_reduction <add>, %176, %cst_67 [0] : vector<10x1xf32> to vector<1xf32>
      %178 = vector.shape_cast %177 : vector<1xf32> to vector<1x1xf32>
      %cst_68 = arith.constant 1.000000e+00 : f32
      %179 = vector.broadcast %cst_68 : f32 to vector<10x1xf32>
      %180 = arith.maximumf %169, %179 : vector<10x1xf32>
      %181 = arith.divf %172, %180 : vector<10x1xf32>
      %cst_69 = arith.constant 0.000000e+00 : f32
      %182 = vector.broadcast %cst_69 : f32 to vector<10x1xf32>
      %183 = arith.select %174, %181, %182 : vector<10x1xi1>, vector<10x1xf32>
      %cst_70 = arith.constant dense<0.000000e+00> : vector<1xf32>
      %184 = vector.multi_reduction <add>, %183, %cst_70 [0] : vector<10x1xf32> to vector<1xf32>
      %185 = vector.shape_cast %184 : vector<1xf32> to vector<1x1xf32>
      %cst_71 = arith.constant 1.000000e+00 : f32
      %186 = vector.broadcast %cst_71 : f32 to vector<1x1xf32>
      %187 = arith.maximumf %178, %186 : vector<1x1xf32>
      %188 = arith.divf %185, %187 : vector<1x1xf32>
      %cst_72 = arith.constant 1.000000e+00 : f32
      %189 = vector.broadcast %cst_72 : f32 to vector<1x1xf32>
      %190 = arith.mulf %188, %189 : vector<1x1xf32>
      %c0_73 = arith.constant 0 : index
      %c0_74 = arith.constant 0 : index
      %191 = vector.load %arg4[%c0_73, %c0_74] : memref<1x1xf32, #tpu.memory_space<vmem>>, vector<1x1xf32>
      tpu.vector_store %arg4[%c0_73, %c0_74], %190 {strides = array<i32>} : memref<1x1xf32, #tpu.memory_space<vmem>>, vector<1x1xf32>,
    } else {
    }
    return
  }
  func.func @transform_0(%arg0: i32) -> (i32, i32) {
    %c0_i32 = arith.constant 0 : i32
    %c0_i32_0 = arith.constant 0 : i32
    return %arg0, %c0_i32 : i32, i32
  }
  func.func @transform_1(%arg0: i32) -> (i32, i32) {
    %c0_i32 = arith.constant 0 : i32
    %c0_i32_0 = arith.constant 0 : i32
    return %arg0, %c0_i32 : i32, i32
  }
  func.func @transform_2(%arg0: i32) -> (i32, i32) {
    %c0_i32 = arith.constant 0 : i32
    %c0_i32_0 = arith.constant 0 : i32
    return %arg0, %c0_i32 : i32, i32
  }
  func.func @transform_3(%arg0: i32) -> (i32, i32) {
    %c0_i32 = arith.constant 0 : i32
    %c0_i32_0 = arith.constant 0 : i32
    %c0_i32_1 = arith.constant 0 : i32
    return %c0_i32, %c0_i32_0 : i32, i32
  }
}

</mosaic_0001>

<bundles_post_ra>
// kernel: tpu_custom_call.1
= control target key start
LH: loop header
LB: loop body
LE: loop exit
PB: predicated region body
PF: predicated region fallthrough
CT: control target
= control target key end

     0   :  { %8 = vsyncpa [#allocation5], 0  ;;  %s639_s0 = inlined_call_operand.hbm [shape: f32[8,128], index: 0, kind: input, shape index: {}]   ;;  %s640_s1 = inlined_call_operand.hbm [shape: f32[8,128], index: 1, kind: input, shape index: {}]   ;;  %s641_s2 = inlined_call_operand.hbm [shape: f32[8,128], index: 2, kind: input, shape index: {}]   ;;  %s642_s3 = inlined_call_operand.hbm [shape: f32[1,1], index: 3, kind: output, shape index: {}]  }
   0x1   :  { %9 = vsyncpa [#allocation8], 0 }
   0x2   :  { %10 = vsyncpa [#allocation6], 0  ;;  %s499_s12 = smov [#allocation7]   ;;  %s500_s14 = smov [#allocation4]  }
   0x3   :  { %s27_s13 = sshll.u32 %s499_s12, 4  ;;  %s17_s15 = sshll.u32 %s500_s14, 4  ;;  %s28_s13 = int_to_ptr.vmem [resolvable:$true] %s27_s13  ;;  %s18_s15 = int_to_ptr.vmem [resolvable:$true] %s17_s15 }
   0x4   :  { %s421_s16 = scalar_lea.vmem %s28_s13, 128  ;;  %p426_p1 = scmp.lt.s32.totalorder %s28_s13, %s28_s13 }
   0x5   :  { %p422_p0 = scmp.ne.s32.totalorder %s28_s13, %s421_s16  ;;  %p427_p2 = scmp.lt.s32.totalorder %s421_s16, %s421_s16 }
   0x7   :  { %p428_p3 = por %p427_p2, %p426_p1 }
   0x9   :  { %p429_p4 = pnand %p428_p3, %p422_p0 }
   0xb   :  { %432 = shalt.err (!%p429_p4)
}
   0xc   :  { %30 = dma.hbm_to_vmem [thread:$0]  %s640_s1, 128, %s28_s13, [#allocation8]  }
   0xd   :  { %s441_s19 = scalar_lea.vmem %s18_s15, 128  ;;  %p446_p6 = scmp.lt.s32.totalorder %s18_s15, %s18_s15 }
   0xe   :  { %p442_p5 = scmp.ne.s32.totalorder %s18_s15, %s441_s19  ;;  %p447_p7 = scmp.lt.s32.totalorder %s441_s19, %s441_s19 }
  0x10   :  { %p448_p8 = por %p447_p7, %p446_p6 }
  0x12   :  { %p449_p9 = pnand %p448_p8, %p442_p5 }
  0x14   :  { %452 = shalt.err (!%p449_p9)
}
  0x15   :  { %20 = dma.hbm_to_vmem [thread:$0]  %s639_s0, 128, %s18_s15, [#allocation5]  }
  0x16   :  { %s501_s22 = smov [#allocation9]  }
  0x17   :  { %s37_s23 = sshll.u32 %s501_s22, 4  ;;  %s38_s23 = int_to_ptr.vmem [resolvable:$true] %s37_s23 }
  0x18   :  { %s461_s24 = scalar_lea.vmem %s38_s23, 128  ;;  %p466_p11 = scmp.lt.s32.totalorder %s38_s23, %s38_s23 }
  0x19   :  { %p462_p10 = scmp.ne.s32.totalorder %s38_s23, %s461_s24  ;;  %p467_p12 = scmp.lt.s32.totalorder %s461_s24, %s461_s24 }
  0x1b   :  { %p468_p13 = por %p467_p12, %p466_p11 }
  0x1d   :  { %p469_p0 = pnand %p468_p13, %p462_p10 }
  0x1f   :  { %472 = shalt.err (!%p469_p0)
}
  0x20   :  { %40 = dma.hbm_to_vmem [thread:$0]  %s641_s2, 128, %s38_s23, [#allocation8]  }
  0x21   :  { %493 = dma.done.wait [#allocation5], 128  }
  0x22   :  { %494 = vsyncadd [#allocation5], 4294967168 }
  0x23   :  { %495 = dma.done.wait [#allocation8], 256  }
  0x24   :  { %496 = vsyncadd [#allocation8], 4294967040  ;;  %v502_v0 = vmov 0.0   ;;  %v58_v1 = vld [vmem:[#allocation4] sm:$0xff]  ;;  %v59_v2 = vld [vmem:[#allocation7] sm:$0xff]  ;;  %s503_s0 = smov [#allocation10]  }
  0x25   :  { %55 = vst [vmem:[#allocation2 + $0x8] sm:$0x3] %v502_v0  ;;  %57 = vst [vmem:[#allocation3] sm:$0x3] %v502_v0  ;;  %v61_v3 = vsub.f32 %v58_v1, %v59_v2  ;;  %v60_v27 = vld [vmem:[#allocation9] sm:$0xff]  ;;  %s366_s2 = sshll.u32 %s503_s0, 4  ;;  %s367_s2 = int_to_ptr.vmem [resolvable:$true] %s366_s2 }
  0x26   :  { %vm75_vm11 = vcmp.gt.f32.partialorder %v60_v27, 0.0  ;;  %s473_s26 = scalar_lea.vmem %s367_s2, 16  ;;  %s477_s27 = scalar_lea.vmem %s367_s2, 32 }
  0x27   :  { %v62_v4 = vmul.f32 %v61_v3, %v61_v3  ;;  %v72_v11 = vand.u32 2147483647, %v61_v3  ;;  %p474_p1 = scmp.ne.s32.totalorder %s367_s2, %s473_s26  ;;  %p478_p2 = scmp.lt.s32.totalorder %s367_s2, %s367_s2 }
  0x28   :  { %p479_p3 = scmp.lt.s32.totalorder %s477_s27, %s473_s26 }
  0x29   :  { %v63_v5 = vadd.f32 0.0004, %v62_v4 }
  0x2a   :  { %p480_p4 = por %p479_p3, %p478_p2 }
  0x2b   :  { %403 = vrsqrt.f32 %v63_v5  ;;  %vm66_vm0 = vcmp.eq.f32.partialorder %v63_v5, inf  ;;  %v69_v7 = vand.u32 2147483648, %v63_v5  ;;  %vm68_vm1 = vcmp.eq.f32.partialorder %v63_v5, 0.0 }
  0x2c   :  { %p481_p5 = pnand %p480_p4, %p474_p1 }
  0x38   :  { %v404_v6 = vpop.eup %403 }
  0x39   :  { %v65_v8 = vmul.f32 %v404_v6, %v63_v5 }
  0x3b   :  { %v67_v9 = vsel %vm66_vm0, %v63_v5, %v65_v8 }
  0x3c   :  { %v70_v10 = vsel %vm68_vm1, %v69_v7, %v67_v9 }
  0x3d   :  { %405 = vrcp.f32 %v70_v10  ;;  %v544_v32 = vadd.f32 -0.02, %v70_v10 }
  0x4a   :  { %v406_v12 = vpop.eup %405 }
  0x4b   :  { %v74_v13 = vmul.f32 %v406_v12, %v72_v11 }
  0x4d   :  { %vm76_vm2 = vcmp.ge.f32.partialorder %v74_v13, 0.1  ;;  %vm80_vm3 = vcmp.ge.f32.partialorder %v74_v13, 0.2  ;;  %vm84_vm4 = vcmp.ge.f32.partialorder %v74_v13, 0.3 }
  0x4e   :  { %v377_v14 = vsel %vm76_vm2, 1.0, %v502_v0  ;;  %v378_v15 = vsel %vm80_vm3, 1.0, %v502_v0  ;;  %v379_v16 = vsel %vm84_vm4, 1.0, %v502_v0  ;;  %vm88_vm5 = vcmp.ge.f32.partialorder %v74_v13, 0.4 }
  0x4f   :  { %v83_v17 = vadd.f32 %v378_v15, %v377_v14  ;;  %vm92_vm6 = vcmp.ge.f32.partialorder %v74_v13, 0.5  ;;  %v380_v18 = vsel %vm88_vm5, 1.0, %v502_v0  ;;  %vm96_vm7 = vcmp.ge.f32.partialorder %v74_v13, 0.6 }
  0x50   :  { %v381_v20 = vsel %vm92_vm6, 1.0, %v502_v0  ;;  %vm100_vm8 = vcmp.ge.f32.partialorder %v74_v13, 0.7  ;;  %v382_v22 = vsel %vm96_vm7, 1.0, %v502_v0  ;;  %vm104_vm9 = vcmp.ge.f32.partialorder %v74_v13, 0.8 }
  0x51   :  { %v87_v19 = vadd.f32 %v379_v16, %v83_v17  ;;  %v383_v24 = vsel %vm100_vm8, 1.0, %v502_v0  ;;  %vm108_vm10 = vcmp.ge.f32.partialorder %v74_v13, 0.9  ;;  %v384_v26 = vsel %vm104_vm9, 1.0, %v502_v0 }
  0x52   :  { %v385_v29 = vsel %vm108_vm10, 1.0, %v502_v0  ;;  %vm275_vm4 = vcmask 1040384   ;;  %vm277_vm5 = vcmask 1041408   ;;  %vm279_vm6 = vcmask 1042432  }
  0x53   :  { %v91_v21 = vadd.f32 %v380_v18, %v87_v19  ;;  %vm281_vm7 = vcmask 1043456   ;;  %vm283_vm8 = vcmask 1044480  }
  0x55   :  { %v95_v23 = vadd.f32 %v381_v20, %v91_v21 }
  0x57   :  { %v99_v25 = vadd.f32 %v382_v22, %v95_v23 }
  0x59   :  { %v103_v28 = vadd.f32 %v383_v24, %v99_v25 }
  0x5b   :  { %v107_v30 = vadd.f32 %v384_v26, %v103_v28 }
  0x5d   :  { %v111_v31 = vadd.f32 %v385_v29, %v107_v30 }
  0x5f   :  { %v546_v33 = vsel %vm75_vm11, %v111_v31, -1.0  ;;  %vm285_vm11 = vcmask 1045504  }
  0x60   :  { %vm113_vm12 = vcmp.eq.f32.partialorder %v546_v33, 0.0  ;;  %vm129_vm13 = vcmp.eq.f32.partialorder %v546_v33, 1.0  ;;  %vm145_vm14 = vcmp.eq.f32.partialorder %v546_v33, 2.0  ;;  %vm161_vm15 = vcmp.eq.f32.partialorder %v546_v33, 3.0 }
  0x61   :  { %v386_v34 = vsel %vm113_vm12, 1.0, %v502_v0  ;;  %v122_v35 = vsel %vm113_vm12, %v544_v32, 0.0  ;;  %v387_v36 = vsel %vm129_vm13, 1.0, %v502_v0  ;;  %v138_v37 = vsel %vm129_vm13, %v544_v32, 0.0 }
  0x62   :  { %v116_v38 = vrot.slane %v386_v34, 4  ;;  %v123_v39 = vrot.slane %v122_v35, 4  ;;  %v132_v40 = vrot.slane %v387_v36, 4  ;;  %v139_v41 = vrot.slane %v138_v37, 4 }
  0x63   :  { %v388_v42 = vsel %vm145_vm14, 1.0, %v502_v0  ;;  %v154_v43 = vsel %vm145_vm14, %v544_v32, 0.0  ;;  %v389_v44 = vsel %vm161_vm15, 1.0, %v502_v0  ;;  %v170_v45 = vsel %vm161_vm15, %v544_v32, 0.0 }
  0x64   :  { %v117_v46 = vadd.f32 %v386_v34, %v116_v38  ;;  %v124_v47 = vadd.f32 %v123_v39, %v122_v35  ;;  %v133_v48 = vadd.f32 %v387_v36, %v132_v40  ;;  %v140_v49 = vadd.f32 %v139_v41, %v138_v37 }
  0x65   :  { %v148_v50 = vrot.slane %v388_v42, 4  ;;  %v155_v51 = vrot.slane %v154_v43, 4  ;;  %v164_v52 = vrot.slane %v389_v44, 4  ;;  %v171_v53 = vrot.slane %v170_v45, 4 }
  0x66   :  { %v118_v54 = vrot.slane %v117_v46, 2  ;;  %v125_v55 = vrot.slane %v124_v47, 2  ;;  %v134_v56 = vrot.slane %v133_v48, 2  ;;  %v141_v57 = vrot.slane %v140_v49, 2 }
  0x67   :  { %v149_v58 = vadd.f32 %v388_v42, %v148_v50  ;;  %v156_v59 = vadd.f32 %v155_v51, %v154_v43  ;;  %v165_v60 = vadd.f32 %v389_v44, %v164_v52  ;;  %v172_v61 = vadd.f32 %v171_v53, %v170_v45 }
  0x68   :  { %v560_v62 = vadd.f32 %v118_v54, %v117_v46  ;;  %v562_v63 = vadd.f32 %v125_v55, %v124_v47  ;;  %v564_v1 = vadd.f32 %v134_v56, %v133_v48  ;;  %v566_v2 = vadd.f32 %v141_v57, %v140_v49 }
  0x69   :  { %v150_v3 = vrot.slane %v149_v58, 2  ;;  %v157_v4 = vrot.slane %v156_v59, 2  ;;  %v166_v5 = vrot.slane %v165_v60, 2  ;;  %v173_v6 = vrot.slane %v172_v61, 2 }
  0x6a   :  { %v120_v11 = vrot.slane %v560_v62, 1  ;;  %v127_v12 = vrot.slane %v562_v63, 1  ;;  %v136_v13 = vrot.slane %v564_v1, 1  ;;  %v143_v14 = vrot.slane %v566_v2, 1 }
  0x6b   :  { %v568_v7 = vadd.f32 %v150_v3, %v149_v58  ;;  %v570_v8 = vadd.f32 %v157_v4, %v156_v59  ;;  %v572_v9 = vadd.f32 %v166_v5, %v165_v60  ;;  %v574_v10 = vadd.f32 %v173_v6, %v172_v61 }
  0x6c   :  { %vm177_vm0 = vcmp.eq.f32.partialorder %v546_v33, 4.0  ;;  %vm193_vm1 = vcmp.eq.f32.partialorder %v546_v33, 5.0  ;;  %vm209_vm2 = vcmp.eq.f32.partialorder %v546_v33, 6.0  ;;  %vm225_vm3 = vcmp.eq.f32.partialorder %v546_v33, 7.0 }
  0x6d   :  { %v152_v15 = vrot.slane %v568_v7, 1  ;;  %v159_v16 = vrot.slane %v570_v8, 1  ;;  %v168_v17 = vrot.slane %v572_v9, 1  ;;  %v175_v18 = vrot.slane %v574_v10, 1 }
  0x6e   :  { %v390_v19 = vsel %vm177_vm0, 1.0, %v502_v0  ;;  %v186_v20 = vsel %vm177_vm0, %v544_v32, 0.0  ;;  %v391_v21 = vsel %vm193_vm1, 1.0, %v502_v0  ;;  %v202_v22 = vsel %vm193_vm1, %v544_v32, 0.0 }
  0x6f   :  { %v180_v23 = vrot.slane %v390_v19, 4  ;;  %v187_v24 = vrot.slane %v186_v20, 4  ;;  %v196_v25 = vrot.slane %v391_v21, 4  ;;  %v203_v26 = vrot.slane %v202_v22, 4 }
  0x70   :  { %v392_v27 = vsel %vm209_vm2, 1.0, %v502_v0  ;;  %v218_v28 = vsel %vm209_vm2, %v544_v32, 0.0  ;;  %v393_v29 = vsel %vm225_vm3, 1.0, %v502_v0  ;;  %v234_v30 = vsel %vm225_vm3, %v544_v32, 0.0 }
  0x71   :  { %v181_v31 = vadd.f32 %v390_v19, %v180_v23  ;;  %v188_v34 = vadd.f32 %v187_v24, %v186_v20  ;;  %v197_v35 = vadd.f32 %v391_v21, %v196_v25  ;;  %v204_v36 = vadd.f32 %v203_v26, %v202_v22 }
  0x72   :  { %v212_v37 = vrot.slane %v392_v27, 4  ;;  %v219_v38 = vrot.slane %v218_v28, 4  ;;  %v228_v39 = vrot.slane %v393_v29, 4  ;;  %v235_v40 = vrot.slane %v234_v30, 4 }
  0x73   :  { %v182_v41 = vrot.slane %v181_v31, 2  ;;  %v189_v42 = vrot.slane %v188_v34, 2  ;;  %v198_v43 = vrot.slane %v197_v35, 2  ;;  %v205_v44 = vrot.slane %v204_v36, 2 }
  0x74   :  { %v213_v45 = vadd.f32 %v392_v27, %v212_v37  ;;  %v220_v46 = vadd.f32 %v219_v38, %v218_v28  ;;  %v229_v47 = vadd.f32 %v393_v29, %v228_v39  ;;  %v236_v48 = vadd.f32 %v235_v40, %v234_v30 }
  0x75   :  { %v183_v49 = vadd.f32 %v182_v41, %v181_v31  ;;  %v190_v50 = vadd.f32 %v189_v42, %v188_v34  ;;  %v199_v51 = vadd.f32 %v198_v43, %v197_v35  ;;  %v206_v52 = vadd.f32 %v205_v44, %v204_v36 }
  0x76   :  { %v214_v53 = vrot.slane %v213_v45, 2  ;;  %v221_v54 = vrot.slane %v220_v46, 2  ;;  %v230_v55 = vrot.slane %v229_v47, 2  ;;  %v237_v56 = vrot.slane %v236_v48, 2 }
  0x77   :  { %v121_v57 = vadd.f32 %v120_v11, %v560_v62  ;;  %v128_v58 = vadd.f32 %v127_v12, %v562_v63  ;;  %v184_v59 = vrot.slane %v183_v49, 1  ;;  %v191_v60 = vrot.slane %v190_v50, 1 }
  0x78   :  { %v137_v61 = vadd.f32 %v136_v13, %v564_v1  ;;  %v144_v3 = vadd.f32 %v143_v14, %v566_v2  ;;  %v200_v4 = vrot.slane %v199_v51, 1  ;;  %v207_v5 = vrot.slane %v206_v52, 1 }
  0x79   :  { %v153_v6 = vadd.f32 %v152_v15, %v568_v7  ;;  %v160_v19 = vadd.f32 %v159_v16, %v570_v8  ;;  %v169_v20 = vadd.f32 %v168_v17, %v572_v9  ;;  %v176_v21 = vadd.f32 %v175_v18, %v574_v10 }
  0x7a   :  { %v215_v62 = vadd.f32 %v214_v53, %v213_v45  ;;  %v222_v11 = vadd.f32 %v221_v54, %v220_v46  ;;  %v231_v63 = vadd.f32 %v230_v55, %v229_v47  ;;  %v238_v12 = vadd.f32 %v237_v56, %v236_v48 }
  0x7b   :  { %v185_v22 = vadd.f32 %v184_v59, %v183_v49  ;;  %v192_v1 = vadd.f32 %v191_v60, %v190_v50  ;;  %vm241_vm9 = vcmp.eq.f32.partialorder %v546_v33, 8.0  ;;  %vm257_vm10 = vcmp.eq.f32.partialorder %v546_v33, 9.0 }
  0x7c   :  { %v201_v2 = vadd.f32 %v200_v4, %v199_v51  ;;  %v208_v13 = vadd.f32 %v207_v5, %v206_v52  ;;  %v276_v7 = vsel %vm275_vm4, %v121_v57, %v137_v61  ;;  %v296_v8 = vsel %vm275_vm4, %v128_v58, %v144_v3  ;;  %v274_v3 = vld [vmem:[#allocation2 + $0x8] sm:$0x3]  ;;  %v295_v4 = vld [vmem:[#allocation3] sm:$0x3] }
  0x7d   :  { %v394_v9 = vsel %vm241_vm9, 1.0, %v502_v0  ;;  %v250_v10 = vsel %vm241_vm9, %v544_v32, 0.0  ;;  %v395_v14 = vsel %vm257_vm10, 1.0, %v502_v0  ;;  %v266_v15 = vsel %vm257_vm10, %v544_v32, 0.0 }
  0x7e   :  { %v244_v16 = vrot.slane %v394_v9, 4  ;;  %v251_v17 = vrot.slane %v250_v10, 4  ;;  %v260_v18 = vrot.slane %v395_v14, 4  ;;  %v267_v23 = vrot.slane %v266_v15, 4 }
  0x7f   :  { %vm287_vm12 = vcmask 1046528   ;;  %v216_v33 = vrot.slane %v215_v62, 1  ;;  %v223_v24 = vrot.slane %v222_v11, 1  ;;  %v278_v25 = vsel %vm277_vm5, %v276_v7, %v153_v6 }
  0x80   :  { %v297_v26 = vsel %vm277_vm5, %v296_v8, %v160_v19  ;;  %v245_v27 = vadd.f32 %v394_v9, %v244_v16  ;;  %v252_v28 = vadd.f32 %v251_v17, %v250_v10  ;;  %v261_v29 = vadd.f32 %v395_v14, %v260_v18 }
  0x81   :  { %v268_v30 = vadd.f32 %v267_v23, %v266_v15  ;;  %v232_v31 = vrot.slane %v231_v63, 1  ;;  %v239_v34 = vrot.slane %v238_v12, 1  ;;  %v280_v35 = vsel %vm279_vm6, %v278_v25, %v169_v20 }
  0x82   :  { %v298_v32 = vsel %vm279_vm6, %v297_v26, %v176_v21  ;;  %v246_v36 = vrot.slane %v245_v27, 2  ;;  %v253_v37 = vrot.slane %v252_v28, 2  ;;  %v262_v38 = vrot.slane %v261_v29, 2 }
  0x83   :  { %v269_v39 = vrot.slane %v268_v30, 2  ;;  %v217_v40 = vadd.f32 %v216_v33, %v215_v62  ;;  %v224_v41 = vadd.f32 %v223_v24, %v222_v11  ;;  %v282_v42 = vsel %vm281_vm7, %v280_v35, %v185_v22 }
  0x84   :  { %v299_v43 = vsel %vm281_vm7, %v298_v32, %v192_v1  ;;  %v247_v44 = vadd.f32 %v246_v36, %v245_v27  ;;  %v254_v45 = vadd.f32 %v253_v37, %v252_v28  ;;  %v263_v46 = vadd.f32 %v262_v38, %v261_v29 }
  0x85   :  { %v270_v47 = vadd.f32 %v269_v39, %v268_v30  ;;  %v233_v48 = vadd.f32 %v232_v31, %v231_v63  ;;  %v240_v49 = vadd.f32 %v239_v34, %v238_v12  ;;  %v284_v50 = vsel %vm283_vm8, %v282_v42, %v201_v2 }
  0x86   :  { %v300_v51 = vsel %vm283_vm8, %v299_v43, %v208_v13  ;;  %v248_v52 = vrot.slane %v247_v44, 1  ;;  %v255_v53 = vrot.slane %v254_v45, 1  ;;  %v264_v54 = vrot.slane %v263_v46, 1 }
  0x87   :  { %v271_v55 = vrot.slane %v270_v47, 1  ;;  %v286_v56 = vsel %vm285_vm11, %v284_v50, %v217_v40  ;;  %v301_v57 = vsel %vm285_vm11, %v300_v51, %v224_v41  ;;  %vm358_vm15 = vcmask 0  }
  0x88   :  { %v249_v58 = vadd.f32 %v248_v52, %v247_v44  ;;  %v256_v59 = vadd.f32 %v255_v53, %v254_v45  ;;  %v265_v60 = vadd.f32 %v264_v54, %v263_v46  ;;  %v288_v5 = vsel %vm287_vm12, %v286_v56, %v233_v48 }
  0x89   :  { %v272_v61 = vadd.f32 %v271_v55, %v270_v47  ;;  %v302_v6 = vsel %vm287_vm12, %v301_v57, %v240_v49 }
  0x8a   :  { %v289_v19 = vsel %vm275_vm4, %v249_v58, %v265_v60 }
  0x8b   :  { %v303_v20 = vsel %vm275_vm4, %v256_v59, %v272_v61  ;;  %v291_v21 = vadd.f32 %v289_v19, %v274_v3 }
  0x8c   :  { %v305_v62 = vadd.f32 %v303_v20, %v295_v4 }
  0x8d   :  { %293 = vst [vmem:[#allocation2 + $0x8] sm:$0x3] %v291_v21 }
  0x8e   :  { %307 = vst [vmem:[#allocation3] sm:$0x3] %v305_v62 }
  0x94   :  { %v312_v11 = vld [vmem:[#allocation2 + $0x8] sm:$0x3] }
  0x95   :  { %v319_v63 = vld [vmem:[#allocation3] sm:$0x3]  ;;  %v315_v12 = vsel %vm277_vm5, %v312_v11, 0.0 }
  0x96   :  { %v322_v22 = vsel %vm277_vm5, %v319_v63, 0.0  ;;  %316 = vadd.xlane.f32.xlu0 %v315_v12 }
  0x97   :  { %323 = vadd.xlane.f32.xlu1 %v322_v22 }
  0x9a   :  { %313 = vadd.xlane.f32.xlu0 %v288_v5 }
  0x9b   :  { %320 = vadd.xlane.f32.xlu1 %v302_v6 }
 0x11f   :  { %v317_v1 = vpop.xlane.xlu0 %316 }
 0x120   :  { %vm326_vm13 = vcmp.gt.f32.partialorder %v317_v1, 0.0  ;;  %v340_v2 = vmax.f32 %v317_v1, 1.0  ;;  %v324_v17 = vpop.xlane.xlu1 %323 }
 0x121   :  { %v397_v13 = vsel %vm326_vm13, 1.0, %v502_v0 }
 0x122   :  { %407 = vrcp.f32 %v340_v2  ;;  %v331_v9 = vsel %vm277_vm5, %v397_v13, 0.0 }
 0x123   :  { %v314_v7 = vpop.xlane.xlu0 %313 }
 0x124   :  { %vm325_vm14 = vcmp.gt.f32.partialorder %v314_v7, 0.0  ;;  %v339_v8 = vmax.f32 %v314_v7, 1.0  ;;  %v321_v26 = vpop.xlane.xlu1 %320 }
 0x125   :  { %v396_v10 = vsel %vm325_vm14, 1.0, %v502_v0 }
 0x126   :  { %v332_v14 = vadd.f32 %v396_v10, %v331_v9  ;;  %409 = vrcp.f32 %v339_v8 }
 0x128   :  { %v333_v15 = vrot.slane %v332_v14, 4 }
 0x12a   :  { %v334_v16 = vadd.f32 %v333_v15, %v332_v14 }
 0x12c   :  { %v335_v18 = vrot.slane %v334_v16, 2 }
 0x12e   :  { %v336_v23 = vadd.f32 %v335_v18, %v334_v16 }
 0x12f   :  { %v408_v33 = vpop.eup %407 }
 0x130   :  { %v337_v24 = vrot.slane %v336_v23, 1  ;;  %v344_v25 = vmul.f32 %v408_v33, %v324_v17 }
 0x132   :  { %v338_v27 = vadd.f32 %v337_v24, %v336_v23  ;;  %v346_v29 = vsel %vm326_vm13, %v344_v25, 0.0 }
 0x133   :  { %v410_v28 = vpop.eup %409  ;;  %v347_v0 = vsel %vm277_vm5, %v346_v29, 0.0 }
 0x134   :  { %v355_v30 = vmax.f32 %v338_v27, 1.0  ;;  %v342_v31 = vmul.f32 %v410_v28, %v321_v26 }
 0x136   :  { %411 = vrcp.f32 %v355_v30  ;;  %v345_v34 = vsel %vm325_vm14, %v342_v31, 0.0 }
 0x137   :  { %v348_v35 = vadd.f32 %v347_v0, %v345_v34 }
 0x139   :  { %v349_v32 = vrot.slane %v348_v35, 4 }
 0x13b   :  { %v350_v36 = vadd.f32 %v349_v32, %v348_v35 }
 0x13d   :  { %v351_v37 = vrot.slane %v350_v36, 2 }
 0x13f   :  { %v352_v38 = vadd.f32 %v351_v37, %v350_v36 }
 0x141   :  { %v353_v39 = vrot.slane %v352_v38, 1 }
 0x143   :  { %v412_v40 = vpop.eup %411  ;;  %v354_v41 = vadd.f32 %v353_v39, %v352_v38 }
 0x145   :  { %v357_v42 = vmul.f32 %v412_v40, %v354_v41 }
 0x147   :  { %359 = vst.msk [vmem:[#allocation10] sm:$0x1] %vm358_vm15, %v357_v42 }
 0x148   :  { %484 = shalt.err (!%p481_p5)
}
 0x149   :  { %369 = dma.vmem_to_hbm [thread:$0]  %s367_s2, 16, %s642_s3, [#allocation6]  }
 0x14a   :  { %497 = dma.done.wait [#allocation6], 16  }
 0x14b   :  { %498 = vsyncadd [#allocation6], 4294967280 }
 0x14c   :  { %373 = vsyncpa [#allocation5], 1 }
 0x14d   :  { %374 = vsyncpa [#allocation8], 1 }
 0x14e   :  { %375 = vsyncpa [#allocation6], 1 }

</bundles_post_ra>
